<compile_context>
chip_gen: v7x
topology: tpu7x:2x2x1
jax: 0.10.0
libtpu: 0.0.40
codegen_flags: <defaults>
</compile_context>

<pallas_src>
import functools

import jax
import jax.numpy as jnp
from jax import lax
from jax.experimental import pallas as pl
from jax.experimental.pallas import tpu as pltpu


# ----------------------------------------------------------------------------
# Generation-aware sizing helpers.
# ----------------------------------------------------------------------------
def _vmem_limit_bytes():
    """Scoped-VMEM limit for this kernel, derived from the TPU generation."""
    cap = 64 * 1024 * 1024                       # conservative fallback (v7x)
    try:
        cap = int(pltpu.get_tpu_info().vmem_capacity_bytes)
    except Exception:                            # pragma: no cover
        pass
    cap = min(cap, 128 * 1024 * 1024)
    return max(32 * 1024 * 1024, cap - 8 * 1024 * 1024)


def _choose_bt(B, L, D, out_itemsize):
    """Batch tile so the (bt, L, D) output block is ~4 MiB, bt in [8, 128]."""
    per_sample = max(1, L * D * out_itemsize)
    bt = (4 * 1024 * 1024) // per_sample
    bt = max(8, min(128, int(bt)))
    if bt >= B:
        bt = B
        if B >= 16:
            # Keep >= 2 grid steps so the batch axis can shard across v7x's
            # two TensorCores; a single step is fine on v5e/v6e (1 TC).
            bt = max(8, (((B + 1) // 2) // 8) * 8)
    else:
        bt = max(8, (bt // 8) * 8)   # (8,128) rule for the (bt, D) bias block
    return bt


def _fits_resident(table, ctx, bt, L, D, out_itemsize, vmem_limit):
    """Can the whole class table stay resident in VMEM on this generation?"""
    table_bytes = table.size * jnp.dtype(table.dtype).itemsize
    ctx_bytes = ctx.size * jnp.dtype(ctx.dtype).itemsize
    # The pipeline allocates 2 buffers even for constant-index blocks.
    # TODO(synk): single-buffer table/ctx (pipeline_mode=pl.Buffered(1)) once
    # buffer_count=1 blocks are universally supported; threshold covers 2x.
    need = 2 * (table_bytes + ctx_bytes)
    need += 2 * bt * D * 4                        # bias tile (<= fp32)
    need += 2 * bt * L * D * out_itemsize         # output tile
    return need + (4 * 1024 * 1024) <= vmem_limit


# ----------------------------------------------------------------------------
# Path 1 (preferred): class table resident in VMEM, batch-tiled grid.
# ----------------------------------------------------------------------------
def _resident_kernel(bt, b_total, guard, tgt_ref, table_ref, ctx_ref, bias_ref,
                     out_ref):
    # tgt_ref  : (B,) int32 in SMEM (scalar prefetch)
    # table_ref: (n_cls, 1 + n_sfx, D)  -- row 0 = prefix, rows 1: = suffix
    # ctx_ref  : (n_ctx, D)             -- shared learned context
    # bias_ref : (bt, D)                -- batch tile of per-sample bias
    # out_ref  : (bt, L, D),  L = 1 + n_ctx + n_sfx
    b0 = pl.program_id(0) * bt
    ctx_f32 = ctx_ref[...].astype(jnp.float32)        # hoisted out of the loop

    def emit(i):
        idx = tgt_ref[b0 + i]                          # class id from SMEM
        row = table_ref[idx]                           # (1+n_sfx, D) VMEM gather
        b_row = bias_ref[pl.ds(i, 1), :].astype(jnp.float32)       # (1, D)
        shifted = (ctx_f32 + b_row).astype(out_ref.dtype)          # fp32 add
        slab = jnp.concatenate([row[0:1], shifted, row[1:]], axis=0)
        out_ref[pl.ds(i, 1)] = slab[None]              # one dense (L, D) store

    def body(i, carry):
        if guard:
            @pl.when(b0 + i < b_total)                 # skip ragged tail rows
            def _():
                emit(i)
        else:
            emit(i)
        return carry

    # fori_loop (not a Python loop) bounds vreg live ranges at CLIP widths;
    # fully unroll only small tiles for LLO scheduling visibility.
    unroll = bt if bt <= 8 else 1
    lax.fori_loop(0, bt, body, 0, unroll=unroll)


def _resident_forward(bias, target, table, ctx, vmem_limit, bt):
    B, D = bias.shape
    n_cls, one_plus_sfx, _ = table.shape
    n_ctx = ctx.shape[0]
    L = 1 + n_ctx + (one_plus_sfx - 1)
    out_dtype = table.dtype

    target = target.astype(jnp.int32)
    guard = (B % bt) != 0
    kernel = functools.partial(_resident_kernel, bt, B, guard)

    grid_spec = pltpu.PrefetchScalarGridSpec(
        num_scalar_prefetch=1,
        grid=(pl.cdiv(B, bt),),
        in_specs=[
            # Whole class table, resident across the grid (constant block
            # index -> never re-DMA'd).  _fits_resident budgets the 2x
            # double-buffer the pipeline still allocates for it.
            pl.BlockSpec((n_cls, one_plus_sfx, D), lambda b, tgt: (0, 0, 0)),
            # Shared learned context, resident.
            pl.BlockSpec((n_ctx, D), lambda b, tgt: (0, 0)),
            # Per-step batch tile of bias.
            pl.BlockSpec((bt, D), lambda b, tgt: (b, 0)),
        ],
        out_specs=pl.BlockSpec((bt, L, D), lambda b, tgt: (b, 0, 0)),
    )
    return pl.pallas_call(
        kernel,
        out_shape=jax.ShapeDtypeStruct((B, L, D), out_dtype),
        grid_spec=grid_spec,
        compiler_params=pltpu.CompilerParams(
            dimension_semantics=("parallel",),
            vmem_limit_bytes=vmem_limit),
    )(target, table, ctx, bias)


# ----------------------------------------------------------------------------
# Path 2 (fallback): table stays in HBM, batch-tiled manual gather DMA.
# ----------------------------------------------------------------------------
def _gather_kernel(btg, b_total, nbuf, tgt_ref, table_hbm, ctx_ref, bias_ref,
                   out_ref, rowbuf, sem):
    # table_hbm: (n_cls, 1 + n_sfx, D) in HBM (memory_space=pl.ANY)
    # rowbuf   : (nbuf, 1 + n_sfx, D) VMEM scratch (multi-buffered row gather)
    # sem      : (nbuf,) DMA semaphores
    b0 = pl.program_id(0) * btg
    n_valid = jnp.minimum(btg, b_total - b0)           # ragged last block
    ctx_f32 = ctx_ref[...].astype(jnp.float32)

    def start_gather(i, slot):
        idx = tgt_ref[b0 + i]
        pltpu.make_async_copy(table_hbm.at[idx], rowbuf.at[slot],
                              sem.at[slot]).start()

    # Prime: keep up to `nbuf` row-gather DMAs in flight.
    for j in range(nbuf):
        @pl.when(j < n_valid)
        def _(j=j):
            start_gather(j, j)

    def body(i, carry):
        @pl.when(i < n_valid)
        def _():
            slot = i % nbuf
            pltpu.make_async_copy(table_hbm.at[0], rowbuf.at[slot],
                                  sem.at[slot]).wait()
            row = rowbuf[slot]                          # (1 + n_sfx, D)
            b_row = bias_ref[pl.ds(i, 1), :].astype(jnp.float32)
            shifted = (ctx_f32 + b_row).astype(out_ref.dtype)
            slab = jnp.concatenate([row[0:1], shifted, row[1:]], axis=0)
            out_ref[pl.ds(i, 1)] = slab[None]           # dense (L, D) store

            @pl.when(i + nbuf < n_valid)                # refill drained slot
            def _():
                start_gather(i + nbuf, slot)
        return carry

    lax.fori_loop(0, btg, body, 0)


def _gather_forward(bias, target, table, ctx, vmem_limit, *, btg=16, nbuf=3):
    B, D = bias.shape
    n_cls, one_plus_sfx, _ = table.shape
    n_ctx = ctx.shape[0]
    L = 1 + n_ctx + (one_plus_sfx - 1)
    out_dtype = table.dtype

    if btg >= B:
        btg = B
    else:
        btg = max(8, (btg // 8) * 8)                    # (8,128) rule for bias
    target = target.astype(jnp.int32)
    kernel = functools.partial(_gather_kernel, btg, B, nbuf)

    grid_spec = pltpu.PrefetchScalarGridSpec(
        num_scalar_prefetch=1,
        grid=(pl.cdiv(B, btg),),
        in_specs=[
            pl.BlockSpec(memory_space=pl.ANY),          # merged table in HBM
            pl.BlockSpec((n_ctx, D), lambda b, tgt: (0, 0)),
            pl.BlockSpec((btg, D), lambda b, tgt: (b, 0)),
        ],
        out_specs=pl.BlockSpec((btg, L, D), lambda b, tgt: (b, 0, 0)),
        scratch_shapes=[
            pltpu.VMEM((nbuf, one_plus_sfx, D), table.dtype),
            pltpu.SemaphoreType.DMA((nbuf,)),
        ],
    )
    return pl.pallas_call(
        kernel,
        out_shape=jax.ShapeDtypeStruct((B, L, D), out_dtype),
        grid_spec=grid_spec,
        compiler_params=pltpu.CompilerParams(
            dimension_semantics=("parallel",),
            vmem_limit_bytes=vmem_limit),
    )(target, table, ctx, bias)


# ----------------------------------------------------------------------------
# Public wrapper.
# ----------------------------------------------------------------------------
def prompt_learner_hoi_forward(bias, target, table, ctx):
    """Pallas forward of PromptLearner_hoi.

    Args:
      bias:   (B, D) float  -- per-sample shift for the learned context.
      target: (B,)   int    -- class index per sample.
      table:  (n_cls, 1 + n_sfx, D) -- PRE-MERGED [token_prefix | token_suffix]
              class table (merged once at init, see PromptLearnerHOI).
      ctx:    (n_ctx, D)    -- learned context vectors.
    Returns:
      prompts: (B, 1 + n_ctx + n_sfx, D) in table.dtype.
    """
    B, D = bias.shape
    _, one_plus_sfx, Dt = table.shape
    assert Dt == D and ctx.shape[1] == D
    L = 1 + ctx.shape[0] + (one_plus_sfx - 1)
    out_itemsize = jnp.dtype(table.dtype).itemsize

    vmem_limit = _vmem_limit_bytes()
    bt = _choose_bt(B, L, D, out_itemsize)
    if _fits_resident(table, ctx, bt, L, D, out_itemsize, vmem_limit):
        return _resident_forward(bias, target, table, ctx, vmem_limit, bt)
    return _gather_forward(bias, target, table, ctx, vmem_limit)


class PromptLearnerHOI:
    """Module-style wrapper: the merged class table is built ONCE at init."""

    def __init__(self, token_prefix, token_suffix, ctx):
        # token_prefix: (n_cls, 1, D), token_suffix: (n_cls, n_sfx, D)
        self.table = jnp.concatenate([token_prefix, token_suffix], axis=1)
        self.ctx = ctx

    def __call__(self, bias, target):
        return prompt_learner_hoi_forward(bias, target, self.table, self.ctx)


def _reference(bias, target, token_prefix, token_suffix, ctx):
    prefix = token_prefix[target]                       # (B, 1, D)
    suffix = token_suffix[target]                       # (B, n_sfx, D)
    shifted = (ctx[None, :, :].astype(jnp.float32)
               + bias[:, None, :].astype(jnp.float32)).astype(token_prefix.dtype)
    return jnp.concatenate([prefix, shifted, suffix], axis=1)


if __name__ == "__main__":
    # Small deterministic setup consistent with the module:
    #   n_ctx = 5 (fixed in __init__), ctx_dim = D, prompt length L,
    #   token_prefix = embedding[:, :1, :], token_suffix = embedding[:, 1+n_ctx:, :]
    # TODO(synk): CLIP tokenizer / token_embedding construction of the class
    # table is host-side init work; emulated with deterministic random values.
    n_cls, n_ctx, D, L = 6, 5, 128, 16
    n_sfx = L - 1 - n_ctx
    B = 2
    dtype = jnp.float32

    key = jax.random.PRNGKey(0)
    k_emb, k_ctx, k_bias, k_tgt, k_bias2, k_tgt2 = jax.random.split(key, 6)

    # Stand-in for clip_model.token_embedding(tokenized_prompts).
    embedding = jax.random.normal(k_emb, (n_cls, L, D), dtype=dtype)
    token_prefix = embedding[:, :1, :]
    token_suffix = embedding[:, 1 + n_ctx:, :]
    # ctx_vectors ~ N(0, 0.02) as in nn.init.normal_(ctx_vectors, std=0.02)
    ctx = 0.02 * jax.random.normal(k_ctx, (n_ctx, D), dtype=dtype)

    bias = jax.random.normal(k_bias, (B, D), dtype=dtype)
    target = jax.random.randint(k_tgt, (B,), 0, n_cls, dtype=jnp.int32)

    learner = PromptLearnerHOI(token_prefix, token_suffix, ctx)  # merged once

    out = jax.block_until_ready(learner(bias, target))
    ref = _reference(bias, target, token_prefix, token_suffix, ctx)
    assert out.shape == (B, L, D), out.shape
    assert jnp.allclose(out, ref, atol=1e-6, rtol=1e-6), "resident path mismatch"

    # Also exercise the multi-step / ragged-tail resident path and the
    # HBM-gather fallback path (forced small tiles, still tiny shapes).
    B2 = 20
    bias2 = jax.random.normal(k_bias2, (B2, D), dtype=dtype)
    target2 = jax.random.randint(k_tgt2, (B2,), 0, n_cls, dtype=jnp.int32)
    ref2 = _reference(bias2, target2, token_prefix, token_suffix, ctx)

    out2 = jax.block_until_ready(
        _resident_forward(bias2, target2, learner.table, ctx,
                          _vmem_limit_bytes(), bt=8))
    assert jnp.allclose(out2, ref2, atol=1e-6, rtol=1e-6), "ragged resident mismatch"

    out3 = jax.block_until_ready(
        _gather_forward(bias2, target2, learner.table, ctx, _vmem_limit_bytes()))
    assert jnp.allclose(out3, ref2, atol=1e-6, rtol=1e-6), "gather fallback mismatch"

    print("KERNEL_OK")
</pallas_src>

<mosaic_0001>
module attributes {stable_mosaic.version = 11 : i64} {
  func.func @_resident_kernel(%arg0: i32, %arg1: memref<2xi32, #tpu.memory_space<smem>>, %arg2: memref<6x11x128xf32, #tpu.memory_space<vmem>>, %arg3: memref<5x128xf32, #tpu.memory_space<vmem>>, %arg4: memref<2x128xf32, #tpu.memory_space<vmem>>, %arg5: memref<2x16x128xf32, #tpu.memory_space<vmem>>) attributes {dimension_semantics = [#tpu.dimension_semantics<parallel>], iteration_bounds = array<i64: 1>, scalar_prefetch = 1 : i64, scratch_operands = 0 : i64, tpu.core_type = #tpu.core_type<tc>, window_params = [{pipeline_mode = #tpu.pipeline_mode<synchronous>, transform_indices = @transform_0, window_bounds = array<i64: 6, 11, 128>}, {pipeline_mode = #tpu.pipeline_mode<synchronous>, transform_indices = @transform_1, window_bounds = array<i64: 5, 128>}, {transform_indices = @transform_2, window_bounds = array<i64: 2, 128>}, {transform_indices = @transform_3, window_bounds = array<i64: 2, 16, 128>}]} {
    %c2_i32 = arith.constant 2 : i32
    %0 = arith.muli %arg0, %c2_i32 : i32
    %c0 = arith.constant 0 : index
    %c0_0 = arith.constant 0 : index
    %1 = vector.load %arg3[%c0, %c0_0] : memref<5x128xf32, #tpu.memory_space<vmem>>, vector<5x128xf32>
    %c0_i32 = arith.constant 0 : i32
    %2 = arith.addi %0, %c0_i32 : i32
    %3 = arith.index_cast %2 : i32 to index
    %4 = memref.load %arg1[%3] : memref<2xi32, #tpu.memory_space<smem>>
    %5 = arith.index_cast %4 : i32 to index
    %c0_1 = arith.constant 0 : index
    %c0_2 = arith.constant 0 : index
    %6 = vector.load %arg2[%5, %c0_1, %c0_2] : memref<6x11x128xf32, #tpu.memory_space<vmem>>, vector<1x11x128xf32>
    %7 = vector.shape_cast %6 : vector<1x11x128xf32> to vector<11x128xf32>
    %8 = arith.index_cast %c0_i32 : i32 to index
    %c0_3 = arith.constant 0 : index
    %9 = vector.load %arg4[%8, %c0_3] : memref<2x128xf32, #tpu.memory_space<vmem>>, vector<1x128xf32>
    %10 = vector.broadcast %9 : vector<1x128xf32> to vector<5x128xf32>
    %11 = arith.addf %1, %10 : vector<5x128xf32>
    %12 = vector.extract_strided_slice %7 {offsets = [0, 0], sizes = [1, 128], strides = [1, 1]} : vector<11x128xf32> to vector<1x128xf32>
    %13 = vector.extract_strided_slice %7 {offsets = [1, 0], sizes = [10, 128], strides = [1, 1]} : vector<11x128xf32> to vector<10x128xf32>
    %14 = tpu.concatenate %12, %11, %13 in 0 : vector<1x128xf32>, vector<5x128xf32>, vector<10x128xf32> -> vector<16x128xf32>
    %15 = vector.shape_cast %14 : vector<16x128xf32> to vector<1x16x128xf32>
    %16 = arith.index_cast %c0_i32 : i32 to index
    %c0_4 = arith.constant 0 : index
    %c0_5 = arith.constant 0 : index
    %17 = vector.load %arg5[%16, %c0_4, %c0_5] : memref<2x16x128xf32, #tpu.memory_space<vmem>>, vector<1x16x128xf32>
    tpu.vector_store %arg5[%16, %c0_4, %c0_5], %15 {strides = array<i32>} : memref<2x16x128xf32, #tpu.memory_space<vmem>>, vector<1x16x128xf32>,
    %c1_i32 = arith.constant 1 : i32
    %18 = arith.addi %0, %c1_i32 : i32
    %19 = arith.index_cast %18 : i32 to index
    %20 = memref.load %arg1[%19] : memref<2xi32, #tpu.memory_space<smem>>
    %21 = arith.index_cast %20 : i32 to index
    %c0_6 = arith.constant 0 : index
    %c0_7 = arith.constant 0 : index
    %22 = vector.load %arg2[%21, %c0_6, %c0_7] : memref<6x11x128xf32, #tpu.memory_space<vmem>>, vector<1x11x128xf32>
    %23 = vector.shape_cast %22 : vector<1x11x128xf32> to vector<11x128xf32>
    %24 = arith.index_cast %c1_i32 : i32 to index
    %c0_8 = arith.constant 0 : index
    %25 = vector.load %arg4[%24, %c0_8] : memref<2x128xf32, #tpu.memory_space<vmem>>, vector<1x128xf32>
    %26 = vector.broadcast %25 : vector<1x128xf32> to vector<5x128xf32>
    %27 = arith.addf %1, %26 : vector<5x128xf32>
    %28 = vector.extract_strided_slice %23 {offsets = [0, 0], sizes = [1, 128], strides = [1, 1]} : vector<11x128xf32> to vector<1x128xf32>
    %29 = vector.extract_strided_slice %23 {offsets = [1, 0], sizes = [10, 128], strides = [1, 1]} : vector<11x128xf32> to vector<10x128xf32>
    %30 = tpu.concatenate %28, %27, %29 in 0 : vector<1x128xf32>, vector<5x128xf32>, vector<10x128xf32> -> vector<16x128xf32>
    %31 = vector.shape_cast %30 : vector<16x128xf32> to vector<1x16x128xf32>
    %32 = arith.index_cast %c1_i32 : i32 to index
    %c0_9 = arith.constant 0 : index
    %c0_10 = arith.constant 0 : index
    %33 = vector.load %arg5[%32, %c0_9, %c0_10] : memref<2x16x128xf32, #tpu.memory_space<vmem>>, vector<1x16x128xf32>
    tpu.vector_store %arg5[%32, %c0_9, %c0_10], %31 {strides = array<i32>} : memref<2x16x128xf32, #tpu.memory_space<vmem>>, vector<1x16x128xf32>,
    %c2_i32_11 = arith.constant 2 : i32
    return
  }
  func.func @transform_0(%arg0: i32, %arg1: memref<2xi32, #tpu.memory_space<smem>>) -> (i32, i32, i32) {
    %c0_i32 = arith.constant 0 : i32
    %c0_i32_0 = arith.constant 0 : i32
    %c0_i32_1 = arith.constant 0 : i32
    %c0_i32_2 = arith.constant 0 : i32
    return %c0_i32, %c0_i32_0, %c0_i32_1 : i32, i32, i32
  }
  func.func @transform_1(%arg0: i32, %arg1: memref<2xi32, #tpu.memory_space<smem>>) -> (i32, i32) {
    %c0_i32 = arith.constant 0 : i32
    %c0_i32_0 = arith.constant 0 : i32
    %c0_i32_1 = arith.constant 0 : i32
    return %c0_i32, %c0_i32_0 : i32, i32
  }
  func.func @transform_2(%arg0: i32, %arg1: memref<2xi32, #tpu.memory_space<smem>>) -> (i32, i32) {
    %c0_i32 = arith.constant 0 : i32
    %c0_i32_0 = arith.constant 0 : i32
    return %arg0, %c0_i32 : i32, i32
  }
  func.func @transform_3(%arg0: i32, %arg1: memref<2xi32, #tpu.memory_space<smem>>) -> (i32, i32, i32) {
    %c0_i32 = arith.constant 0 : i32
    %c0_i32_0 = arith.constant 0 : i32
    %c0_i32_1 = arith.constant 0 : i32
    return %arg0, %c0_i32, %c0_i32_0 : i32, i32, i32
  }
}

</mosaic_0001>

<bundles_post_ra>
// kernel: tpu_custom_call.1
= control target key start
LH: loop header
LB: loop body
LE: loop exit
PB: predicated region body
PF: predicated region fallthrough
CT: control target
= control target key end

     0   :  { %s211_s0 = inlined_call_operand.vmem [shape: s32[2], index: 0, kind: input, shape index: {}]   ;;  %s212_s1 = inlined_call_operand.vmem [shape: f32[6,11,128], index: 1, kind: input, shape index: {}]   ;;  %s213_s2 = inlined_call_operand.vmem [shape: f32[5,128], index: 2, kind: input, shape index: {}]   ;;  %s214_s3 = inlined_call_operand.vmem [shape: f32[2,128], index: 3, kind: input, shape index: {}]   ;;  %s215_s4 = inlined_call_operand.hbm [shape: f32[2,16,128], index: 4, kind: output, shape index: {}]  }
   0x1   :  { %s9_s17 = sshll.u32 %s211_s0, 4  ;;  %s10_s17 = int_to_ptr.vmem [resolvable:$true] %s9_s17 }
   0x2   :  { %s108_s18 = scalar_lea.vmem %s10_s17, 16  ;;  %p113_p1 = scmp.lt.s32.totalorder %s10_s17, %s10_s17 }
   0x3   :  { %p109_p0 = scmp.ne.s32.totalorder %s10_s17, %s108_s18  ;;  %p114_p2 = scmp.lt.s32.totalorder %s108_s18, %s108_s18 }
   0x5   :  { %p115_p3 = por %p114_p2, %p113_p1 }
   0x7   :  { %p116_p4 = pnand %p115_p3, %p109_p0 }
   0x9   :  { %119 = shalt.err (!%p116_p4)  }
   0xa   :  { %s146_s19 = smov [#allocation3]  }
   0xb   :  { %12 = dma.vmem_to_smem %s10_s17, 16, %s146_s19, [#allocation2] }
   0xc   :  { %142 = dma.done.wait [#allocation2], 16 }
   0xd   :  { %143 = vsyncadd [#allocation2], 4294967280 }
   0xe   :  { %14 = sfence }
   0xf   :  { %v23_v0 = vld [vmem:[%s213_s2] sm:$0x1f]  ;;  %s24_s22 = sld [smem:[#allocation3]]  ;;  %s101_s24 = sld [smem:[#allocation3 + $0x1]] }
  0x10   :  { %v100_v1 = vld [vmem:[%s214_s3] ss:$0 sm:$0xff]  ;;  %v103_v3 = vld [vmem:[%s214_s3 + $0x1] ss:$0 sm:$0xff] }
  0x11   :  { %v34_v2 = vadd.f32 %v100_v1, %v23_v0 }
  0x12   :  { %15 = vsyncpa [#allocation5], 0  ;;  %v63_v4 = vadd.f32 %v103_v3, %v23_v0  ;;  %vm46_vm0 = vcmask 1040384   ;;  %vm48_vm1 = vcmask 1045504   ;;  %vm40_vm2 = vcmask 1044480   ;;  %s147_s3 = smov [#allocation4]  }
  0x13   :  { %v36_v5 = vrot.slane %v34_v2, 7  ;;  %s84_s8 = sshll.u32 %s147_s3, 4  ;;  %s85_s8 = int_to_ptr.vmem [resolvable:$true] %s84_s8 }
  0x14   :  { %v65_v6 = vrot.slane %v63_v4, 7  ;;  %p125_p6 = scmp.lt.s32.totalorder %s85_s8, %s85_s8 }
  0x15   :  { %s99_s27 = sshll.u32 %s24_s22, 4  ;;  %s102_s30 = sshll.u32 %s101_s24, 4 }
  0x16   :  { %s26_s2 = scalar_lea.vmem %s212_s1, %s99_s27  ;;  %s55_s7 = scalar_lea.vmem %s212_s1, %s102_s30 }
  0x17   :  { %v27_v7 = vld [vmem:[%s26_s2] sm:$0xff]  ;;  %v28_v8 = vld [vmem:[%s26_s2 + $0x8] sm:$0x7]  ;;  %s120_s1 = scalar_lea.vmem %s85_s8, 512 }
  0x18   :  { %v41_v9 = vrot.slane %v27_v7, 3  ;;  %v47_v10 = vsel %vm46_vm0, %v27_v7, %v36_v5  ;;  %v42_v11 = vrot.slane %v28_v8, 3  ;;  %v56_v12 = vld [vmem:[%s55_s7] sm:$0xff]  ;;  %v57_v13 = vld [vmem:[%s55_s7 + $0x8] sm:$0x7]  ;;  %p121_p5 = scmp.ne.s32.totalorder %s85_s8, %s120_s1  ;;  %p126_p7 = scmp.lt.s32.totalorder %s120_s1, %s120_s1 }
  0x19   :  { %v69_v14 = vrot.slane %v56_v12, 3  ;;  %v74_v15 = vsel %vm46_vm0, %v56_v12, %v65_v6  ;;  %v70_v16 = vrot.slane %v57_v13, 3 }
  0x1a   :  { %v49_v17 = vsel %vm48_vm1, %v47_v10, %v41_v9  ;;  %v43_v18 = vsel %vm40_vm2, %v41_v9, %v42_v11  ;;  %p127_p8 = por %p126_p7, %p125_p6 }
  0x1b   :  { %50 = vst [vmem:[#allocation4] sm:$0xff] %v49_v17  ;;  %51 = vst [vmem:[#allocation4 + $0x8] sm:$0xff] %v43_v18  ;;  %v75_v19 = vsel %vm48_vm1, %v74_v15, %v69_v14  ;;  %v71_v20 = vsel %vm40_vm2, %v69_v14, %v70_v16 }
  0x1c   :  { %77 = vst [vmem:[#allocation4 + $0x10] sm:$0xff] %v75_v19  ;;  %78 = vst [vmem:[#allocation4 + $0x18] sm:$0xff] %v71_v20  ;;  %p128_p9 = pnand %p127_p8, %p121_p5 }
  0x1e   :  { %131 = shalt.err (!%p128_p9)
}
  0x1f   :  { %s132_s11 = scalar_lea.hbm %s215_s4, 512 }
  0x20   :  { %p133_p10 = scmp.ne.s32.totalorder %s215_s4, %s132_s11  ;;  %p136_p11 = scmp.lt.u32.totalorder %s132_s11, %s215_s4 }
  0x22   :  { %p138_p12 = pnand %p136_p11, %p133_p10 }
  0x24   :  { %141 = shalt.err (!%p138_p12)
}
  0x25   :  { %s148_s16 = smov 128   ;;  %s149_s17 = smov 8  }
  0x26   :  { %90 = dma.vmem_to_hbm [thread:$0]  %s85_s8, 512, %s215_s4, [#allocation5], %s148_s16, %s148_s16, %s149_s17  }
  0x27   :  { %144 = dma.done.wait [#allocation5], 512  }
  0x28   :  { %145 = vsyncadd [#allocation5], 4294966784 }
  0x29   :  { %94 = vsyncpa [#allocation5], 1 }

</bundles_post_ra>
